<compile_context>
chip_gen: v5e
topology: v5e:2x2
jax: 0.10.0
libtpu: 0.0.40
codegen_flags: <defaults>
</compile_context>

<pallas_src>
import numpy as np
import jax
import jax.numpy as jnp
from jax.experimental import pallas as pl
from jax.experimental.pallas import tpu as pltpu

# Hard-coded constants from the reference forward()
RANGES = [(1, 217), (312, 385), (480, 553), (648, 769)]   # lag windows
KERNEL_SIZE = 25                                          # moving-average kernel
MIN_SCALE = 1e-10                                         # MeanScaler minimum scale
MASKED_LENGTH = sum(r1 - r0 for r0, r1 in RANGES)         # 483
PAST_LENGTH = RANGES[-1][1]                               # 769 (context length)
LANE = 128                                                # TPU lane width


def _softplus(x):
    # numerically stable softplus built from ops guaranteed to lower on Mosaic
    return jnp.maximum(x, 0.0) + jnp.log(1.0 + jnp.exp(-jnp.abs(x)))


# ---------------------------------------------------------------------------
# Fused kernel: MeanScaler + folded (lags ∘ decomp ∘ heads ∘ args_proj) + domain map
# Column layout of the padded output block:
#   [0, P)      df    = 2 + softplus(raw)
#   [P, 2P)     loc   = raw
#   [2P, 3P)    scale = softplus(raw)
#   col 3P      MeanScaler scale (packed; spare padded lane)
#   (3P, 128)   unused zero-padded lanes
# ---------------------------------------------------------------------------
def _make_dlinear_kernel(P):
    def kernel(pt_ref, po_ref, w_ref, b_ref, ds_ref, out_ref):
        x = pt_ref[...]            # (TB, T) past_target
        obs = po_ref[...]          # (TB, T) past_observed_values

        # ---- MeanScaler(keepdim=True): scale = weighted mean of |x|, loc = 0 ----
        ts_sum = jnp.sum(jnp.abs(x) * obs, axis=1, keepdims=True)      # (TB, 1)
        num_obs = jnp.sum(obs, axis=1, keepdims=True)                  # (TB, 1)
        scale = ts_sum / jnp.maximum(num_obs, 1.0)
        scale = jnp.where(num_obs > 0.0, scale, ds_ref[0])             # batch-global default
        scale = jnp.maximum(scale, MIN_SCALE)
        inv_scale = pl.reciprocal(scale)                               # (TB, 1)

        # ---- folded affine map, scaling applied to the matmul OUTPUT ----
        raw = (jnp.dot(x, w_ref[...], preferred_element_type=jnp.float32)
               * inv_scale + b_ref[...])                               # (TB, 128)

        # ---- StudentTOutput domain map via column mask; pack scale into col 3P ----
        col = jax.lax.broadcasted_iota(jnp.int32, raw.shape, 1)
        sp = _softplus(raw)
        out_ref[...] = jnp.where(col < P, 2.0 + sp,
                        jnp.where(col < 2 * P, raw,
                         jnp.where(col < 3 * P, sp, scale)))
    return kernel


# ---------------------------------------------------------------------------
# Offline parameter folding (float64 numpy, cast to f32, lane-padded to 128)
# ---------------------------------------------------------------------------
def fold_dlinear_params(params, prediction_length, hidden_dimension):
    """Fold lag selection S, moving-average A, the two heads and args_proj into a
    single (past_length, n_pad) affine map, zero-padded to a full 128-lane width."""
    T, L, K = PAST_LENGTH, MASKED_LENGTH, KERNEL_SIZE
    P, H = prediction_length, hidden_dimension
    pad = (K - 1) // 2

    # lag selection: lags = x_scaled @ S       (S: T x L)
    S = np.zeros((T, L), np.float64)
    off = 0
    for (r0, r1) in RANGES:
        n = r1 - r0
        S[np.arange(T - r1, T - r0), np.arange(off, off + n)] = 1.0
        off += n

    # edge-replicated moving average: trend = lags @ A    (A: L x L)
    A = np.zeros((L, L), np.float64)
    for j in range(L):
        for k in range(K):
            i = min(max(j - pad + k, 0), L - 1)
            A[i, j] += 1.0 / K

    Ws = np.asarray(params["w_seasonal"], np.float64)   # (L, P*H)
    Wt = np.asarray(params["w_trend"], np.float64)      # (L, P*H)
    bs = np.asarray(params["b_seasonal"], np.float64)   # (1, P*H)
    bt = np.asarray(params["b_trend"], np.float64)      # (1, P*H)
    Wp = np.asarray(params["w_proj"], np.float64)       # (H, 3)  cols = [df, loc, scale]
    bp = np.asarray(params["b_proj"], np.float64)       # (1, 3)

    W_head = (np.eye(L) - A) @ Ws + A @ Wt               # (L, P*H)   res@Ws + trend@Wt
    b_head = bs + bt                                     # (1, P*H)
    W_lag = S @ W_head                                   # (T, P*H)

    # fold args projection; column layout = [df (P) | loc (P) | scale (P)]
    W_fold = np.einsum("tph,hc->tcp", W_lag.reshape(T, P, H), Wp).reshape(T, 3 * P)
    b_fold = (np.einsum("ph,hc->cp", b_head.reshape(P, H), Wp)
              + bp.reshape(3, 1)).reshape(1, 3 * P)

    # zero-pad the output axis to a full lane width (+1 spare column for scale)
    n_pad = max(LANE, -(-(3 * P + 1) // LANE) * LANE)
    W_pad = np.zeros((T, n_pad), np.float32)
    W_pad[:, :3 * P] = W_fold
    b_pad = np.zeros((1, n_pad), np.float32)
    b_pad[0, :3 * P] = b_fold

    return {"w_fold": jnp.asarray(W_pad), "b_fold": jnp.asarray(b_pad)}


# ---------------------------------------------------------------------------
# Wrapper
# ---------------------------------------------------------------------------
def dlinear_forward(folded_params, past_target, past_observed_values, past_time_feat,
                    prediction_length, hidden_dimension):
    del past_time_feat, hidden_dimension   # unused by the reference forward / folded kernel
    B, T = past_target.shape
    assert T == PAST_LENGTH
    P = prediction_length
    w = folded_params["w_fold"]
    b = folded_params["b_fold"]
    n_pad = w.shape[1]
    assert 3 * P + 1 <= n_pad

    # Batch-GLOBAL default scale of MeanScaler, hoisted out of the kernel so the
    # batch grid stays exact (kernel blocks would otherwise compute it block-locally).
    ts_sum_tot = jnp.sum(jnp.abs(past_target) * past_observed_values)
    num_obs_tot = jnp.sum(past_observed_values)
    default_scale = (ts_sum_tot / jnp.maximum(num_obs_tot, 1.0)
                     ).reshape(1).astype(jnp.float32)

    # Batch row-blocks: pipelined and megacore-splittable for large serving batches.
    TB = B if B <= 512 else 512
    grid = (pl.cdiv(B, TB),)

    cost = pl.CostEstimate(
        flops=2 * B * T * n_pad + 8 * B * T,
        transcendentals=B * n_pad,
        bytes_accessed=4 * (2 * B * T + T * n_pad + n_pad + B * n_pad + 1),
    )

    out = pl.pallas_call(
        _make_dlinear_kernel(P),
        out_shape=jax.ShapeDtypeStruct((B, n_pad), jnp.float32),
        grid=grid,
        in_specs=[
            pl.BlockSpec((TB, T), lambda i: (i, 0)),          # past_target row block
            pl.BlockSpec((TB, T), lambda i: (i, 0)),          # past_observed row block
            pl.BlockSpec((T, n_pad), lambda i: (0, 0)),       # folded weight (resident)
            pl.BlockSpec((1, n_pad), lambda i: (0, 0)),       # folded bias   (resident)
            pl.BlockSpec(memory_space=pltpu.MemorySpace.SMEM),  # default_scale scalar
        ],
        out_specs=pl.BlockSpec((TB, n_pad), lambda i: (i, 0)),
        compiler_params=pltpu.CompilerParams(
            dimension_semantics=("parallel",)),
        cost_estimate=cost,
    )(past_target, past_observed_values, w, b, default_scale)

    df = out[:, 0:P]
    dloc = out[:, P:2 * P]
    dscale = out[:, 2 * P:3 * P]
    scale = out[:, 3 * P:3 * P + 1]          # packed into spare padded column
    loc = jnp.zeros((B, 1), jnp.float32)     # MeanScaler loc is identically zero
    return (df, dloc, dscale), loc, scale


# ---------------------------------------------------------------------------
# Pure-JAX reference (un-folded, mirrors the PyTorch forward) for correctness check
# ---------------------------------------------------------------------------
def dlinear_reference(params, past_target, past_observed_values, P, H):
    B, T = past_target.shape
    ts_sum = jnp.sum(jnp.abs(past_target) * past_observed_values, axis=1, keepdims=True)
    num_obs = jnp.sum(past_observed_values, axis=1, keepdims=True)
    scale = ts_sum / jnp.maximum(num_obs, 1.0)
    default_scale = jnp.sum(ts_sum) / jnp.maximum(jnp.sum(num_obs), 1.0)
    scale = jnp.maximum(jnp.where(num_obs > 0.0, scale, default_scale), MIN_SCALE)
    loc = jnp.zeros_like(scale)
    xs = past_target / scale

    lags = jnp.concatenate([xs[:, T - r1:T - r0] for (r0, r1) in RANGES], axis=-1)
    pad = (KERNEL_SIZE - 1) // 2
    padded = jnp.concatenate(
        [jnp.repeat(lags[:, :1], pad, axis=1), lags, jnp.repeat(lags[:, -1:], pad, axis=1)],
        axis=1)
    L = lags.shape[1]
    trend = sum(padded[:, k:k + L] for k in range(KERNEL_SIZE)) / KERNEL_SIZE
    res = lags - trend

    nn_out = (res @ params["w_seasonal"] + params["b_seasonal"]
              + trend @ params["w_trend"] + params["b_trend"])
    h = nn_out.reshape(-1, H)
    raw = h @ params["w_proj"] + params["b_proj"]
    sp = jax.nn.softplus
    df = (2.0 + sp(raw[:, 0])).reshape(-1, P)
    dloc = raw[:, 1].reshape(-1, P)
    dscale = sp(raw[:, 2]).reshape(-1, P)
    return (df, dloc, dscale), loc, scale


if __name__ == "__main__":
    # Small model config consistent with the forward pass
    B = 2
    prediction_length = 8
    hidden_dimension = 32
    input_dimension = 3
    context_length = PAST_LENGTH          # must be 769 due to hard-coded lag ranges
    L = MASKED_LENGTH
    PH = prediction_length * hidden_dimension

    key = jax.random.PRNGKey(0)
    k_ws, k_wt, k_bs, k_bt, k_wp, k_bp, k_x, k_o, k_tf = jax.random.split(key, 9)

    params = {
        "w_seasonal": 0.02 * jax.random.normal(k_ws, (L, PH), jnp.float32),
        "b_seasonal": 0.01 * jax.random.normal(k_bs, (1, PH), jnp.float32),
        "w_trend":    0.02 * jax.random.normal(k_wt, (L, PH), jnp.float32),
        "b_trend":    0.01 * jax.random.normal(k_bt, (1, PH), jnp.float32),
        "w_proj":     0.10 * jax.random.normal(k_wp, (hidden_dimension, 3), jnp.float32),
        "b_proj":     0.01 * jax.random.normal(k_bp, (1, 3), jnp.float32),
    }

    past_target = jax.random.normal(k_x, (B, context_length), jnp.float32)
    past_observed_values = (jax.random.uniform(k_o, (B, context_length)) > 0.1).astype(jnp.float32)
    past_time_feat = jax.random.normal(k_tf, (B, context_length, input_dimension), jnp.float32)

    folded = fold_dlinear_params(params, prediction_length, hidden_dimension)

    (df, dloc, dscale), loc, scale = dlinear_forward(
        folded, past_target, past_observed_values, past_time_feat,
        prediction_length, hidden_dimension)
    jax.block_until_ready((df, dloc, dscale, loc, scale))

    (rdf, rdloc, rdscale), rloc, rscale = dlinear_reference(
        params, past_target, past_observed_values, prediction_length, hidden_dimension)

    assert df.shape == (B, prediction_length)
    assert dloc.shape == (B, prediction_length)
    assert dscale.shape == (B, prediction_length)
    assert loc.shape == (B, 1) and scale.shape == (B, 1)
    assert jnp.allclose(df, rdf, rtol=2e-4, atol=2e-4)
    assert jnp.allclose(dloc, rdloc, rtol=2e-4, atol=2e-4)
    assert jnp.allclose(dscale, rdscale, rtol=2e-4, atol=2e-4)
    assert jnp.allclose(loc, rloc, rtol=1e-5, atol=1e-6)
    assert jnp.allclose(scale, rscale, rtol=1e-5, atol=1e-6)

    print("KERNEL_OK")
</pallas_src>

<mosaic_0001>
module attributes {stable_mosaic.version = 11 : i64} {
  func.func @kernel(%arg0: i32, %arg1: memref<2x769xf32, #tpu.memory_space<vmem>>, %arg2: memref<2x769xf32, #tpu.memory_space<vmem>>, %arg3: memref<769x128xf32, #tpu.memory_space<vmem>>, %arg4: memref<1x128xf32, #tpu.memory_space<vmem>>, %arg5: memref<1xf32, #tpu.memory_space<smem>>, %arg6: memref<2x128xf32, #tpu.memory_space<vmem>>) attributes {dimension_semantics = [#tpu.dimension_semantics<parallel>], iteration_bounds = array<i64: 1>, scalar_prefetch = 0 : i64, scratch_operands = 0 : i64, tpu.core_type = #tpu.core_type<tc>, window_params = [{transform_indices = @transform_0, window_bounds = array<i64: 2, 769>}, {transform_indices = @transform_1, window_bounds = array<i64: 2, 769>}, {pipeline_mode = #tpu.pipeline_mode<synchronous>, transform_indices = @transform_2, window_bounds = array<i64: 769, 128>}, {pipeline_mode = #tpu.pipeline_mode<synchronous>, transform_indices = @transform_3, window_bounds = array<i64: 1, 128>}, {transform_indices = @transform_4, window_bounds = array<i64: 1>}, {transform_indices = @transform_5, window_bounds = array<i64: 2, 128>}]} {
    %c0 = arith.constant 0 : index
    %c0_0 = arith.constant 0 : index
    %0 = vector.load %arg1[%c0, %c0_0] : memref<2x769xf32, #tpu.memory_space<vmem>>, vector<2x769xf32>
    %c0_1 = arith.constant 0 : index
    %c0_2 = arith.constant 0 : index
    %1 = vector.load %arg2[%c0_1, %c0_2] : memref<2x769xf32, #tpu.memory_space<vmem>>, vector<2x769xf32>
    %2 = math.absf %0 : vector<2x769xf32>
    %3 = arith.mulf %2, %1 : vector<2x769xf32>
    %cst = arith.constant dense<0.000000e+00> : vector<2xf32>
    %4 = vector.multi_reduction <add>, %3, %cst [1] : vector<2x769xf32> to vector<2xf32>
    %5 = vector.shape_cast %4 : vector<2xf32> to vector<2x1xf32>
    %cst_3 = arith.constant dense<0.000000e+00> : vector<2xf32>
    %6 = vector.multi_reduction <add>, %1, %cst_3 [1] : vector<2x769xf32> to vector<2xf32>
    %7 = vector.shape_cast %6 : vector<2xf32> to vector<2x1xf32>
    %cst_4 = arith.constant 1.000000e+00 : f32
    %8 = vector.broadcast %cst_4 : f32 to vector<2x1xf32>
    %9 = arith.maximumf %7, %8 : vector<2x1xf32>
    %10 = arith.divf %5, %9 : vector<2x1xf32>
    %cst_5 = arith.constant 0.000000e+00 : f32
    %11 = vector.broadcast %cst_5 : f32 to vector<2x1xf32>
    %12 = arith.cmpf ogt, %7, %11 : vector<2x1xf32>
    %c0_6 = arith.constant 0 : index
    %13 = memref.load %arg5[%c0_6] : memref<1xf32, #tpu.memory_space<smem>>
    %14 = vector.broadcast %13 : f32 to vector<2x1xf32>
    %15 = arith.select %12, %10, %14 : vector<2x1xi1>, vector<2x1xf32>
    %cst_7 = arith.constant 1.000000e-10 : f32
    %16 = vector.broadcast %cst_7 : f32 to vector<2x1xf32>
    %17 = arith.maximumf %15, %16 : vector<2x1xf32>
    %18 = tpu.reciprocal %17 : vector<2x1xf32> -> vector<2x1xf32>
    %c0_8 = arith.constant 0 : index
    %c0_9 = arith.constant 0 : index
    %19 = vector.load %arg3[%c0_8, %c0_9] : memref<769x128xf32, #tpu.memory_space<vmem>>, vector<769x128xf32>
    %cst_10 = arith.constant dense<0.000000e+00> : vector<2x128xf32>
    %20 = tpu.matmul %0, %19, %cst_10 {dimension_numbers = #tpu.dot_dimension_numbers<[1], [0], [0], [1], [0, 0, 1, 1], [], []>} : vector<2x769xf32>, vector<769x128xf32>, vector<2x128xf32> -> vector<2x128xf32>
    %21 = vector.broadcast %18 : vector<2x1xf32> to vector<2x128xf32>
    %22 = arith.mulf %20, %21 : vector<2x128xf32>
    %c0_11 = arith.constant 0 : index
    %c0_12 = arith.constant 0 : index
    %23 = vector.load %arg4[%c0_11, %c0_12] : memref<1x128xf32, #tpu.memory_space<vmem>>, vector<1x128xf32>
    %24 = vector.broadcast %23 : vector<1x128xf32> to vector<2x128xf32>
    %25 = arith.addf %22, %24 : vector<2x128xf32>
    %26 = tpu.iota {dimensions = array<i32: 1>} : vector<2x128xi32>
    %cst_13 = arith.constant 0.000000e+00 : f32
    %27 = vector.broadcast %cst_13 : f32 to vector<2x128xf32>
    %28 = arith.maximumf %25, %27 : vector<2x128xf32>
    %29 = math.absf %25 : vector<2x128xf32>
    %cst_14 = arith.constant 0.000000e+00 : f32
    %30 = vector.broadcast %cst_14 : f32 to vector<2x128xf32>
    %31 = arith.subf %30, %29 : vector<2x128xf32>
    %32 = math.exp %31 : vector<2x128xf32>
    %cst_15 = arith.constant 1.000000e+00 : f32
    %33 = vector.broadcast %cst_15 : f32 to vector<2x128xf32>
    %34 = arith.addf %33, %32 : vector<2x128xf32>
    %35 = math.log %34 : vector<2x128xf32>
    %36 = arith.addf %28, %35 : vector<2x128xf32>
    %c8_i32 = arith.constant 8 : i32
    %37 = vector.broadcast %c8_i32 : i32 to vector<2x128xi32>
    %38 = arith.cmpi slt, %26, %37 : vector<2x128xi32>
    %cst_16 = arith.constant 2.000000e+00 : f32
    %39 = vector.broadcast %cst_16 : f32 to vector<2x128xf32>
    %40 = arith.addf %39, %36 : vector<2x128xf32>
    %c16_i32 = arith.constant 16 : i32
    %41 = vector.broadcast %c16_i32 : i32 to vector<2x128xi32>
    %42 = arith.cmpi slt, %26, %41 : vector<2x128xi32>
    %c24_i32 = arith.constant 24 : i32
    %43 = vector.broadcast %c24_i32 : i32 to vector<2x128xi32>
    %44 = arith.cmpi slt, %26, %43 : vector<2x128xi32>
    %45 = vector.shape_cast %17 : vector<2x1xf32> to vector<2x1xf32>
    %46 = vector.broadcast %45 : vector<2x1xf32> to vector<2x128xf32>
    %47 = arith.select %44, %36, %46 : vector<2x128xi1>, vector<2x128xf32>
    %48 = arith.select %42, %25, %47 : vector<2x128xi1>, vector<2x128xf32>
    %49 = arith.select %38, %40, %48 : vector<2x128xi1>, vector<2x128xf32>
    %c0_17 = arith.constant 0 : index
    %c0_18 = arith.constant 0 : index
    %50 = vector.load %arg6[%c0_17, %c0_18] : memref<2x128xf32, #tpu.memory_space<vmem>>, vector<2x128xf32>
    tpu.vector_store %arg6[%c0_17, %c0_18], %49 {strides = array<i32>} : memref<2x128xf32, #tpu.memory_space<vmem>>, vector<2x128xf32>,
    return
  }
  func.func @transform_0(%arg0: i32) -> (i32, i32) {
    %c0_i32 = arith.constant 0 : i32
    %c0_i32_0 = arith.constant 0 : i32
    return %arg0, %c0_i32 : i32, i32
  }
  func.func @transform_1(%arg0: i32) -> (i32, i32) {
    %c0_i32 = arith.constant 0 : i32
    %c0_i32_0 = arith.constant 0 : i32
    return %arg0, %c0_i32 : i32, i32
  }
  func.func @transform_2(%arg0: i32) -> (i32, i32) {
    %c0_i32 = arith.constant 0 : i32
    %c0_i32_0 = arith.constant 0 : i32
    %c0_i32_1 = arith.constant 0 : i32
    return %c0_i32, %c0_i32_0 : i32, i32
  }
  func.func @transform_3(%arg0: i32) -> (i32, i32) {
    %c0_i32 = arith.constant 0 : i32
    %c0_i32_0 = arith.constant 0 : i32
    %c0_i32_1 = arith.constant 0 : i32
    return %c0_i32, %c0_i32_0 : i32, i32
  }
  func.func @transform_4(%arg0: i32) -> i32 {
    %c0_i32 = arith.constant 0 : i32
    %c0_i32_0 = arith.constant 0 : i32
    return %c0_i32 : i32
  }
  func.func @transform_5(%arg0: i32) -> (i32, i32) {
    %c0_i32 = arith.constant 0 : i32
    %c0_i32_0 = arith.constant 0 : i32
    return %arg0, %c0_i32 : i32, i32
  }
}

</mosaic_0001>

<bundles_post_ra>
// kernel: tpu_custom_call.1
= control target key start
LH: loop header
LB: loop body
LE: loop exit
PB: predicated region body
PF: predicated region fallthrough
CT: control target
= control target key end

     0   :  { %11 = vsyncpa [#allocation4], 0  ;;  %s699_s0 = inlined_call_operand.hbm [shape: f32[2,769], index: 0, kind: input, shape index: {}]   ;;  %s700_s1 = inlined_call_operand.hbm [shape: f32[2,769], index: 1, kind: input, shape index: {}]   ;;  %s701_s2 = inlined_call_operand.hbm [shape: f32[769,128], index: 2, kind: input, shape index: {}]   ;;  %s702_s3 = inlined_call_operand.vmem [shape: f32[1,128], index: 3, kind: input, shape index: {}]   ;;  %s703_s4 = inlined_call_operand.<no memory space> [shape: f32[1], index: 4, kind: input, shape index: {}]   ;;  %s704_s5 = inlined_call_operand.hbm [shape: f32[2,128], index: 5, kind: output, shape index: {}]  }
   0x1   :  { %12 = vsyncpa [#allocation7], 0  ;;  %s30_s20 = sshll.u32 %s700_s1, 4  ;;  %s31_s20 = int_to_ptr.hbm [resolvable:$true] %s30_s20 }
   0x2   :  { %13 = vsyncpa [#allocation5], 0  ;;  %s602_s21 = smov [#allocation6]   ;;  %s19_s25 = sshll.u32 %s699_s0, 4  ;;  %s20_s25 = int_to_ptr.hbm [resolvable:$true] %s19_s25 }
   0x3   :  { %s32_s22 = sshll.u32 %s602_s21, 4  ;;  %s603_s26 = smov [#allocation3]   ;;  %s33_s22 = int_to_ptr.vmem [resolvable:$true] %s32_s22 }
   0x4   :  { %35 = dma.hbm_to_vmem [thread:$0]  %s31_s20, 224, %s33_s22, [#allocation7]  }
   0x5   :  { %s21_s27 = sshll.u32 %s603_s26, 4  ;;  %s40_s30 = sshll.u32 %s701_s2, 4  ;;  %s22_s27 = int_to_ptr.vmem [resolvable:$true] %s21_s27  ;;  %s41_s30 = int_to_ptr.hbm [resolvable:$true] %s40_s30 }
   0x6   :  { %24 = dma.hbm_to_vmem [thread:$0]  %s20_s25, 224, %s22_s27, [#allocation4]  }
   0x7   :  { %s604_s1 = smov [#allocation8]   ;;  %s605_s7 = smov 128  }
   0x8   :  { %s42_s6 = sshll.u32 %s604_s1, 4  ;;  %s606_s8 = smov 8   ;;  %s43_s6 = int_to_ptr.vmem [resolvable:$true] %s42_s6 }
   0x9   :  { %48 = dma.hbm_to_vmem [thread:$0]  %s41_s30, 12416, %s43_s6, [#allocation7], %s605_s7, %s605_s7, %s606_s8  }
   0xa   :  { %596 = dma.done.wait [#allocation4], 224  }
   0xb   :  { %597 = vsyncadd [#allocation4], 4294967072 }
   0xc   :  { %598 = dma.done.wait [#allocation7], 12640  }
   0xd   :  { %599 = vsyncadd [#allocation7], 4294954656  ;;  %v193_v0 = vld [vmem:[#allocation8 + $0x78] sm:$0xff]  ;;  %v192_v1 = vld [vmem:[#allocation8 + $0x70] sm:$0xff]  ;;  %vm92_vm0 = vcmask 1041408   ;;  %vm296_vm1 = vcmask 1040384  }
   0xe   :  { %v209_v2 = vld [vmem:[#allocation8 + $0xf8] sm:$0xff]  ;;  %300 = vmatpush.msra.mxu0 %v193_v0  ;;  %v208_v3 = vld [vmem:[#allocation8 + $0xf0] sm:$0xff]  ;;  %v191_v4 = vld [vmem:[#allocation8 + $0x68] sm:$0xff]  ;;  %vm104_vm2 = vcmask 1024   ;;  %vm293_vm3 = vcmask 7168   ;;  %s607_s10 = smov [#allocation9]  }
   0xf   :  { %320 = vmatpush.msra.mxu1 %v209_v2  ;;  %v207_v5 = vld [vmem:[#allocation8 + $0xe8] sm:$0xff]  ;;  %v190_v6 = vld [vmem:[#allocation8 + $0x60] sm:$0xff]  ;;  %v189_v8 = vld [vmem:[#allocation8 + $0x58] sm:$0xff]  ;;  %s472_s13 = sshll.u32 %s704_s5, 4  ;;  %s473_s13 = int_to_ptr.hbm [resolvable:$true] %s472_s13 }
  0x10   :  { %301 = vmatpush.msra.mxu0 %v192_v1  ;;  %v206_v7 = vld [vmem:[#allocation8 + $0xe0] sm:$0xff]  ;;  %v205_v9 = vld [vmem:[#allocation8 + $0xd8] sm:$0xff]  ;;  %v224_v11 = vld [vmem:[#allocation8 + $0x170] sm:$0xff] }
  0x11   :  { %321 = vmatpush.msra.mxu1 %v208_v3  ;;  %v225_v10 = vld [vmem:[#allocation8 + $0x178] sm:$0xff]  ;;  %v188_v13 = vld [vmem:[#allocation8 + $0x50] sm:$0xff]  ;;  %v223_v15 = vld [vmem:[#allocation8 + $0x168] sm:$0xff] }
  0x12   :  { %302 = vmatpush.msra.mxu0 %v191_v4  ;;  %v241_v12 = vld [vmem:[#allocation8 + $0x1f8] sm:$0xff]  ;;  %v204_v14 = vld [vmem:[#allocation8 + $0xd0] sm:$0xff]  ;;  %340 = vmatpush.msra.mxu2 %v225_v10  ;;  %v187_v17 = vld [vmem:[#allocation8 + $0x48] sm:$0xff] }
  0x13   :  { %322 = vmatpush.msra.mxu1 %v207_v5  ;;  %360 = vmatpush.msra.mxu3 %v241_v12  ;;  %v240_v16 = vld [vmem:[#allocation8 + $0x1f0] sm:$0xff]  ;;  %v203_v18 = vld [vmem:[#allocation8 + $0xc8] sm:$0xff]  ;;  %v222_v20 = vld [vmem:[#allocation8 + $0x160] sm:$0xff] }
  0x14   :  { %303 = vmatpush.msra.mxu0 %v190_v6  ;;  %341 = vmatpush.msra.mxu2 %v224_v11  ;;  %v239_v19 = vld [vmem:[#allocation8 + $0x1e8] sm:$0xff]  ;;  %v238_v21 = vld [vmem:[#allocation8 + $0x1e0] sm:$0xff]  ;;  %v221_v24 = vld [vmem:[#allocation8 + $0x158] sm:$0xff] }
  0x15   :  { %323 = vmatpush.msra.mxu1 %v206_v7  ;;  %361 = vmatpush.msra.mxu3 %v240_v16  ;;  %v186_v22 = vld [vmem:[#allocation8 + $0x40] sm:$0xff]  ;;  %v237_v25 = vld [vmem:[#allocation8 + $0x1d8] sm:$0xff]  ;;  %v184_v27 = vld [vmem:[#allocation8 + $0x30] sm:$0xff] }
  0x16   :  { %304 = vmatpush.msra.mxu0 %v189_v8  ;;  %v202_v23 = vld [vmem:[#allocation8 + $0xc0] sm:$0xff]  ;;  %342 = vmatpush.msra.mxu2 %v223_v15  ;;  %v185_v26 = vld [vmem:[#allocation8 + $0x38] sm:$0xff]  ;;  %v200_v29 = vld [vmem:[#allocation8 + $0xb0] sm:$0xff] }
  0x17   :  { %324 = vmatpush.msra.mxu1 %v205_v9  ;;  %362 = vmatpush.msra.mxu3 %v239_v19  ;;  %v201_v28 = vld [vmem:[#allocation8 + $0xb8] sm:$0xff]  ;;  %v220_v30 = vld [vmem:[#allocation8 + $0x150] sm:$0xff]  ;;  %v183_v32 = vld [vmem:[#allocation8 + $0x28] sm:$0xff] }
  0x18   :  { %305 = vmatpush.msra.mxu0 %v188_v13  ;;  %343 = vmatpush.msra.mxu2 %v222_v20  ;;  %v236_v31 = vld [vmem:[#allocation8 + $0x1d0] sm:$0xff]  ;;  %v199_v33 = vld [vmem:[#allocation8 + $0xa8] sm:$0xff]  ;;  %v653_v39 = vld [vmem:[#allocation6 + $0x8] sm:$0x3f] }
  0x19   :  { %325 = vmatpush.msra.mxu1 %v204_v14  ;;  %363 = vmatpush.msra.mxu3 %v238_v21  ;;  %v219_v34 = vld [vmem:[#allocation8 + $0x148] sm:$0xff]  ;;  %v651_v38 = vld [vmem:[#allocation6] sm:$0xff]  ;;  %v218_v42 = vld [vmem:[#allocation8 + $0x140] sm:$0xff] }
  0x1a   :  { %306 = vmatpush.msra.mxu0 %v187_v17  ;;  %344 = vmatpush.msra.mxu2 %v221_v24  ;;  %v235_v35 = vld [vmem:[#allocation8 + $0x1c8] sm:$0xff]  ;;  %v182_v43 = vld [vmem:[#allocation8 + $0x20] sm:$0xff]  ;;  %v181_v47 = vld [vmem:[#allocation8 + $0x18] sm:$0xff] }
  0x1b   :  { %326 = vmatpush.msra.mxu1 %v203_v18  ;;  %364 = vmatpush.msra.mxu3 %v237_v25  ;;  %v647_v36 = vld [vmem:[#allocation3] sm:$0xff]  ;;  %v649_v37 = vld [vmem:[#allocation3 + $0x8] sm:$0x3f]  ;;  %v197_v48 = vld [vmem:[#allocation8 + $0x98] sm:$0xff] }
  0x1c   :  { %307 = vmatpush.msra.mxu0 %v186_v22  ;;  %345 = vmatpush.msra.mxu2 %v220_v30  ;;  %v69_v40 = vand.u32 2147483647, %v647_v36  ;;  %v70_v41 = vand.u32 2147483647, %v649_v37  ;;  %v198_v44 = vld [vmem:[#allocation8 + $0xa0] sm:$0xff]  ;;  %v180_v49 = vld [vmem:[#allocation8 + $0x10] sm:$0xff] }
  0x1d   :  { %327 = vmatpush.msra.mxu1 %v202_v23  ;;  %365 = vmatpush.msra.mxu3 %v236_v31  ;;  %v217_v50 = vld [vmem:[#allocation8 + $0x138] sm:$0xff]  ;;  %v234_v51 = vld [vmem:[#allocation8 + $0x1c0] sm:$0xff]  ;;  %v196_v52 = vld [vmem:[#allocation8 + $0x90] sm:$0xff] }
  0x1e   :  { %308 = vmatpush.msra.mxu0 %v185_v26  ;;  %346 = vmatpush.msra.mxu2 %v219_v34  ;;  %v71_v45 = vmul.f32 %v69_v40, %v651_v38  ;;  %v72_v46 = vmul.f32 %v70_v41, %v653_v39  ;;  %v216_v53 = vld [vmem:[#allocation8 + $0x130] sm:$0xff]  ;;  %v233_v54 = vld [vmem:[#allocation8 + $0x1b8] sm:$0xff]  ;;  %v179_v55 = vld [vmem:[#allocation8 + $0x8] sm:$0xff] }
  0x1f   :  { %328 = vmatpush.msra.mxu1 %v201_v28  ;;  %366 = vmatpush.msra.mxu3 %v235_v35  ;;  %v215_v56 = vld [vmem:[#allocation8 + $0x128] sm:$0xff]  ;;  %v178_v57 = vld [vmem:[#allocation8] sm:$0xff]  ;;  %v232_v59 = vld [vmem:[#allocation8 + $0x1b0] sm:$0xff] }
  0x20   :  { %309 = vmatpush.msra.mxu0 %v184_v27  ;;  %347 = vmatpush.msra.mxu2 %v218_v42  ;;  %75 = vst [vmem:[#allocation1] ss:$4 sm:$0xff] %v71_v45  ;;  %v195_v58 = vld [vmem:[#allocation8 + $0x88] sm:$0xff]  ;;  %v257_v60 = vld [vmem:[#allocation8 + $0x278] sm:$0xff]  ;;  %v194_v61 = vld [vmem:[#allocation8 + $0x80] sm:$0xff] }
  0x21   :  { %329 = vmatpush.msra.mxu1 %v200_v29  ;;  %77 = vst [vmem:[#allocation1 + $0x20] ss:$4 sm:$0xff] %v72_v46  ;;  %367 = vmatpush.msra.mxu3 %v234_v51  ;;  %v214_v62 = vld [vmem:[#allocation8 + $0x120] sm:$0xff]  ;;  %v231_v63 = vld [vmem:[#allocation8 + $0x1a8] sm:$0xff]  ;;  %v273_v0 = vld [vmem:[#allocation8 + $0x2f8] sm:$0xff] }
  0x22   :  { %310 = vmatpush.msra.mxu0 %v183_v32  ;;  %348 = vmatpush.msra.mxu2 %v217_v50  ;;  %v213_v1 = vld [vmem:[#allocation8 + $0x118] sm:$0xff]  ;;  %v230_v2 = vld [vmem:[#allocation8 + $0x1a0] sm:$0xff]  ;;  %v256_v3 = vld [vmem:[#allocation8 + $0x270] sm:$0xff] }
  0x23   :  { %330 = vmatpush.msra.mxu1 %v199_v33  ;;  %368 = vmatpush.msra.mxu3 %v233_v54  ;;  %v272_v6 = vld [vmem:[#allocation8 + $0x2f0] sm:$0xff]  ;;  %v255_v12 = vld [vmem:[#allocation8 + $0x268] sm:$0xff]  ;;  %v229_v15 = vld [vmem:[#allocation8 + $0x198] sm:$0xff] }
  0x24   :  { %311 = vmatpush.msra.mxu0 %v182_v43  ;;  %349 = vmatpush.msra.mxu2 %v216_v53  ;;  %v271_v13 = vld [vmem:[#allocation8 + $0x2e8] sm:$0xff]  ;;  %v212_v14 = vld [vmem:[#allocation8 + $0x110] sm:$0xff]  ;;  %v254_v17 = vld [vmem:[#allocation8 + $0x260] sm:$0xff] }
  0x25   :  { %331 = vmatpush.msra.mxu1 %v198_v44  ;;  %369 = vmatpush.msra.mxu3 %v232_v59  ;;  %v211_v16 = vld [vmem:[#allocation8 + $0x108] sm:$0xff]  ;;  %v270_v18 = vld [vmem:[#allocation8 + $0x2e0] sm:$0xff]  ;;  %v228_v19 = vld [vmem:[#allocation8 + $0x190] sm:$0xff] }
  0x26   :  { %312 = vmatpush.msra.mxu0 %v181_v47  ;;  %350 = vmatpush.msra.mxu2 %v215_v56  ;;  %v210_v20 = vld [vmem:[#allocation8 + $0x100] sm:$0xff]  ;;  %v227_v21 = vld [vmem:[#allocation8 + $0x188] sm:$0xff]  ;;  %v253_v24 = vld [vmem:[#allocation8 + $0x258] sm:$0xff] }
  0x27   :  { %332 = vmatpush.msra.mxu1 %v197_v48  ;;  %v78_v4 = vld.sshfl [vmem:[#allocation1] sm:$0xff pattern:$0x73625140]  ;;  %v79_v5 = vld.sshfl [vmem:[#allocation1 + $0x8] sm:$0xff pattern:$0x73625140]  ;;  %370 = vmatpush.msra.mxu3 %v231_v63 }
  0x28   :  { %313 = vmatpush.msra.mxu0 %v180_v49  ;;  %v80_v7 = vld.sshfl [vmem:[#allocation1 + $0x10] sm:$0xff pattern:$0x73625140]  ;;  %v659_v8 = vld.sshfl [vmem:[#allocation1 + $0x18] sm:$0xff pattern:$0x73625140]  ;;  %351 = vmatpush.msra.mxu2 %v214_v62 }
  0x29   :  { %333 = vmatpush.msra.mxu1 %v196_v52  ;;  %v661_v9 = vld.sshfl [vmem:[#allocation1 + $0x20] sm:$0xff pattern:$0x73625140]  ;;  %v663_v10 = vld.sshfl [vmem:[#allocation1 + $0x28] sm:$0xff pattern:$0x73625140]  ;;  %371 = vmatpush.msra.mxu3 %v230_v2 }
  0x2a   :  { %314 = vmatpush.msra.mxu0 %v179_v55  ;;  %v665_v11 = vld.sshfl [vmem:[#allocation1 + $0x30] sm:$0xff pattern:$0x73625140]  ;;  %111 = vst [vmem:[#allocation1] ss:$4 sm:$0xff] %v651_v38  ;;  %352 = vmatpush.msra.mxu2 %v213_v1  ;;  %v93_v22 = vsel %vm92_vm0, %v78_v4, 0.0 }
  0x2b   :  { %334 = vmatpush.msra.mxu1 %v195_v58  ;;  %113 = vst [vmem:[#allocation1 + $0x20] ss:$4 sm:$0xff] %v653_v39  ;;  %372 = vmatpush.msra.mxu3 %v229_v15  ;;  %v94_v23 = vsel %vm92_vm0, %v79_v5, 0.0  ;;  %v252_v25 = vld [vmem:[#allocation8 + $0x250] sm:$0xff]  ;;  %v269_v26 = vld [vmem:[#allocation8 + $0x2d8] sm:$0xff]  ;;  %v226_v28 = vld [vmem:[#allocation8 + $0x180] sm:$0xff] }
  0x2c   :  { %315 = vmatpush.msra.mxu0 %v178_v57  ;;  %353 = vmatpush.msra.mxu2 %v212_v14  ;;  %v268_v27 = vld [vmem:[#allocation8 + $0x2d0] sm:$0xff]  ;;  %v274_v29 = vld [vmem:[#allocation8 + $0x300] sm:$0x1]  ;;  %v96_v30 = vsel %vm92_vm0, %v80_v7, 0.0  ;;  %v251_v33 = vld [vmem:[#allocation8 + $0x248] sm:$0xff]  ;;  %v95_v35 = vadd.f32 %v94_v23, %v93_v22  ;;  %v98_v51 = vsel %vm92_vm0, %v659_v8, 0.0 }
  0x2d   :  { %335 = vmatpush.msra.mxu1 %v194_v61  ;;  %373 = vmatpush.msra.mxu3 %v228_v19  ;;  %v267_v34 = vld [vmem:[#allocation8 + $0x2c8] sm:$0xff]  ;;  %v250_v47 = vld [vmem:[#allocation8 + $0x240] sm:$0xff]  ;;  %v249_v53 = vld [vmem:[#allocation8 + $0x238] sm:$0xff]  ;;  %v102_v63 = vsel %vm92_vm0, %v663_v10, 0.0  ;;  %v105_v15 = vsel %vm104_vm2, %v665_v11, 0.0 }
  0x2e   :  { %380 = vmatpush.msrb.mxu0 %v257_v60  ;;  %354 = vmatpush.msra.mxu2 %v211_v16  ;;  %v266_v48 = vld [vmem:[#allocation8 + $0x2c0] sm:$0xff]  ;;  %v97_v49 = vadd.f32 %v96_v30, %v95_v35  ;;  %v265_v54 = vld [vmem:[#allocation8 + $0x2b8] sm:$0xff]  ;;  %v248_v56 = vld [vmem:[#allocation8 + $0x230] sm:$0xff] }
  0x2f   :  { %400 = vmatpush.msrb.mxu1 %v273_v0  ;;  %374 = vmatpush.msra.mxu3 %v227_v21  ;;  %v264_v57 = vld [vmem:[#allocation8 + $0x2b0] sm:$0xff]  ;;  %v247_v61 = vld [vmem:[#allocation8 + $0x228] sm:$0xff]  ;;  %v246_v0 = vld [vmem:[#allocation8 + $0x220] sm:$0xff] }
  0x30   :  { %381 = vmatpush.msrb.mxu0 %v256_v3  ;;  %355 = vmatpush.msra.mxu2 %v210_v20  ;;  %v99_v58 = vadd.f32 %v98_v51, %v97_v49  ;;  %v263_v1 = vld [vmem:[#allocation8 + $0x2a8] sm:$0xff]  ;;  %v244_v10 = vld [vmem:[#allocation8 + $0x210] sm:$0xff]  ;;  %v261_v14 = vld [vmem:[#allocation8 + $0x298] sm:$0xff] }
  0x31   :  { %401 = vmatpush.msrb.mxu1 %v272_v6  ;;  %v114_v31 = vld.sshfl [vmem:[#allocation1] sm:$0xff pattern:$0x73625140]  ;;  %v115_v32 = vld.sshfl [vmem:[#allocation1 + $0x8] sm:$0xff pattern:$0x73625140]  ;;  %375 = vmatpush.msra.mxu3 %v226_v28 }
  0x32   :  { %382 = vmatpush.msrb.mxu0 %v255_v12  ;;  %v116_v38 = vld.sshfl [vmem:[#allocation1 + $0x10] sm:$0xff pattern:$0x73625140]  ;;  %v117_v39 = vld.sshfl [vmem:[#allocation1 + $0x18] sm:$0xff pattern:$0x73625140]  ;;  %483 = vmatpush.msk.msrb.mxu2 %vm296_vm1, %v274_v29 }
  0x33   :  { %402 = vmatpush.msrb.mxu1 %v271_v13  ;;  %v118_v40 = vld.sshfl [vmem:[#allocation1 + $0x20] sm:$0xff pattern:$0x73625140]  ;;  %v119_v41 = vld.sshfl [vmem:[#allocation1 + $0x28] sm:$0xff pattern:$0x73625140] }
  0x34   :  { %383 = vmatpush.msrb.mxu0 %v254_v17  ;;  %v120_v42 = vld.sshfl [vmem:[#allocation1 + $0x30] sm:$0xff pattern:$0x73625140]  ;;  %v128_v43 = vsel %vm92_vm0, %v114_v31, 0.0  ;;  %v129_v44 = vsel %vm92_vm0, %v115_v32, 0.0  ;;  %v131_v45 = vsel %vm92_vm0, %v116_v38, 0.0 }
  0x35   :  { %403 = vmatpush.msrb.mxu1 %v270_v18  ;;  %v130_v46 = vadd.f32 %v129_v44, %v128_v43  ;;  %279 = vst [vmem:[#allocation1 + $0x20] ss:$4 sm:$0xff] %v649_v37  ;;  %v133_v50 = vsel %vm92_vm0, %v117_v39, 0.0  ;;  %v135_v55 = vsel %vm92_vm0, %v118_v40, 0.0  ;;  %v137_v59 = vsel %vm92_vm0, %v119_v41, 0.0  ;;  %v262_v12 = vld [vmem:[#allocation8 + $0x2a0] sm:$0xff] }
  0x36   :  { %384 = vmatpush.msrb.mxu0 %v253_v24  ;;  %277 = vst [vmem:[#allocation1] ss:$4 sm:$0xff] %v647_v36  ;;  %v100_v36 = vsel %vm92_vm0, %v661_v9, 0.0  ;;  %v139_v62 = vsel %vm104_vm2, %v120_v42, 0.0  ;;  %v245_v9 = vld [vmem:[#allocation8 + $0x218] sm:$0xff]  ;;  %v243_v16 = vld [vmem:[#allocation8 + $0x208] sm:$0xff]  ;;  %v161_v41 = vstv %s703_s4 }
  0x37   :  { %404 = vmatpush.msrb.mxu1 %v269_v26  ;;  %v132_v52 = vadd.f32 %v131_v45, %v130_v46  ;;  %v101_v5 = vadd.f32 %v100_v36, %v99_v58  ;;  %v260_v17 = vld [vmem:[#allocation8 + $0x290] sm:$0xff]  ;;  %v242_v20 = vld [vmem:[#allocation8 + $0x200] sm:$0xff]  ;;  %v259_v21 = vld [vmem:[#allocation8 + $0x288] sm:$0xff] }
  0x38   :  { %385 = vmatpush.msrb.mxu0 %v252_v25  ;;  %v258_v23 = vld [vmem:[#allocation8 + $0x280] sm:$0xff] }
  0x39   :  { %405 = vmatpush.msrb.mxu1 %v268_v27  ;;  %v134_v37 = vadd.f32 %v133_v50, %v132_v52  ;;  %v103_v13 = vadd.f32 %v102_v63, %v101_v5  ;;  %v491_v63 = vld [vmem:[%s702_s3] ss:$0 sm:$0xff]  ;;  %s470_s3 = sshll.u32 %s607_s10, 4  ;;  %s471_s3 = int_to_ptr.vmem [resolvable:$true] %s470_s3 }
  0x3a   :  { %386 = vmatpush.msrb.mxu0 %v251_v33 }
  0x3b   :  { %406 = vmatpush.msrb.mxu1 %v267_v34  ;;  %v136_v60 = vadd.f32 %v135_v55, %v134_v37  ;;  %v106_v19 = vadd.f32 %v105_v15, %v103_v13 }
  0x3c   :  { %387 = vmatpush.msrb.mxu0 %v250_v47  ;;  %v286_v18 = vld.sshfl [vmem:[#allocation1 + $0x30] sm:$0xff pattern:$0x73625140]  ;;  %v284_v22 = vld.sshfl [vmem:[#allocation1 + $0x20] sm:$0xff pattern:$0x73625140] }
  0x3d   :  { %407 = vmatpush.msrb.mxu1 %v266_v48  ;;  %v138_v2 = vadd.f32 %v137_v59, %v136_v60  ;;  %v282_v3 = vld.sshfl [vmem:[#allocation1 + $0x10] sm:$0xff pattern:$0x73625140]  ;;  %v283_v4 = vld.sshfl [vmem:[#allocation1 + $0x18] sm:$0xff pattern:$0x73625140] }
  0x3e   :  { %388 = vmatpush.msrb.mxu0 %v249_v53  ;;  %356 = vmatmul.f32.vlgmr.msra.gmra.mxu2 %v282_v3  ;;  %v280_v6 = vld.sshfl [vmem:[#allocation1] sm:$0xff pattern:$0x73625140]  ;;  %v281_v7 = vld.sshfl [vmem:[#allocation1 + $0x8] sm:$0xff pattern:$0x73625140] }
  0x3f   :  { %408 = vmatpush.msrb.mxu1 %v265_v54  ;;  %v140_v8 = vadd.f32 %v139_v62, %v138_v2  ;;  %376 = vmatmul.f32.vlgmr.msra.gmra.mxu3 %v283_v4  ;;  %v285_v24 = vld.sshfl [vmem:[#allocation1 + $0x28] sm:$0xff pattern:$0x73625140] }
  0x40   :  { %389 = vmatpush.msrb.mxu0 %v248_v56  ;;  %336 = vmatmul.f32.vlgmr.msra.gmra.mxu1 %v281_v7 }
  0x41   :  { %409 = vmatpush.msrb.mxu1 %v264_v57  ;;  %141 = vadd.xlane.f32.xlu0 %v140_v8  ;;  %v446_v8 = vlaneseq }
  0x42   :  { %390 = vmatpush.msrb.mxu0 %v247_v61 }
  0x43   :  { %410 = vmatpush.msrb.mxu1 %v263_v1  ;;  %316 = vmatmul.f32.vlgmr.msra.gmra.mxu0 %v280_v6 }
  0x44   :  { %391 = vmatpush.msrb.mxu0 %v246_v0 }
  0x45   :  { %411 = vmatpush.msrb.mxu1 %v262_v12 }
  0x46   :  { %392 = vmatpush.msrb.mxu0 %v245_v9  ;;  %484 = vmatmul.msk.f32.vlgmr.msrb.gmra.mxu2 %vm293_vm3, %v286_v18  ;;  %v447_v9 = vand.u32 127, %v446_v8 }
  0x47   :  { %412 = vmatpush.msrb.mxu1 %v261_v14 }
  0x48   :  { %393 = vmatpush.msrb.mxu0 %v244_v10  ;;  %vm460_vm13 = vcmp.lt.s32.totalorder %v447_v9, 24  ;;  %vm459_vm14 = vcmp.lt.s32.totalorder %v447_v9, 16  ;;  %vm457_vm15 = vcmp.lt.s32.totalorder %v447_v9, 8 }
  0x49   :  { %413 = vmatpush.msrb.mxu1 %v260_v17  ;;  %107 = vadd.xlane.f32.xlu0 %v106_v19 }
  0x4a   :  { %394 = vmatpush.msrb.mxu0 %v243_v16 }
  0x4b   :  { %414 = vmatpush.msrb.mxu1 %v259_v21 }
  0x4c   :  { %395 = vmatpush.msrb.mxu0 %v242_v20 }
  0x4d   :  { %396 = vmatmul.f32.vlgmr.msrb.gmra.mxu0 %v284_v22  ;;  %415 = vmatpush.msrb.mxu1 %v258_v23 }
  0x4e   :  { %416 = vmatmul.f32.vlgmr.msrb.gmra.mxu1 %v285_v24 }
  0xb4   :  { %v142_v11 = vpop.xlane.xlu0 %141 }
  0xb5   :  { %v143_v25 = vmax.f32 %v142_v11, 1.0  ;;  %vm159_vm8 = vcmp.gt.f32.partialorder %v142_v11, 0.0 }
  0xb7   :  { %492 = vrcp.f32 %v143_v25  ;;  %v155_v29 = vand.u32 2147483648, %v143_v25  ;;  %v153_v31 = vand.u32 2147483647, %v143_v25  ;;  %vm149_vm5 = vweird.f32 %v143_v25 }
  0xb9   :  { %v156_v34 = vor.u32 1.1754944e-38, %v155_v29  ;;  %vm154_vm7 = vcmp.eq.f32.partialorder %v153_v31, 8.507059e+37 }
  0xbc   :  { %v108_v33 = vpop.xlane.xlu0 %107 }
  0xbd   :  { %v493_v26 = vpop.eup %492  ;;  %v337_v38 = vpop.f32.mrf.mxu1 }
  0xbe   :  { %v145_v27 = vmul.f32 %v493_v26, %v143_v25  ;;  %vm150_vm4 = vweird.f32 %v493_v26 }
  0xbf   :  { %vm151_vm6 = vmor %vm149_vm5, %vm150_vm4 }
  0xc0   :  { %v146_v28 = vsub.f32 1.0, %v145_v27  ;;  %v317_v35 = vpop.f32.mrf.mxu0 }
  0xc1   :  { %v338_v43 = vadd.f32 %v337_v38, %v317_v35  ;;  %v357_v44 = vpop.f32.mrf.mxu2 }
  0xc2   :  { %v147_v30 = vmul.f32 %v493_v26, %v146_v28  ;;  %v377_v48 = vpop.f32.mrf.mxu3 }
  0xc3   :  { %v358_v47 = vadd.f32 %v357_v44, %v338_v43 }
  0xc4   :  { %v148_v32 = vadd.f32 %v493_v26, %v147_v30 }
  0xc5   :  { %v378_v50 = vadd.f32 %v377_v48, %v358_v47 }
  0xc6   :  { %v152_v39 = vsel %vm151_vm6, %v493_v26, %v148_v32 }
  0xc7   :  { %v157_v40 = vsel %vm154_vm7, %v156_v34, %v152_v39 }
  0xc8   :  { %v158_v42 = vmul.f32 %v157_v40, %v108_v33 }
  0xc9   :  { %v437_v57 = vpop.f32.mrf.mxu2 }
  0xca   :  { %v162_v45 = vsel %vm159_vm8, %v158_v42, %v161_v41  ;;  %v397_v49 = vpop.f32.mrf.mxu0 }
  0xcb   :  { %v163_v46 = vmax.f32 %v162_v45, 1e-10  ;;  %v398_v51 = vadd.f32 %v397_v49, %v378_v50  ;;  %v417_v53 = vpop.f32.mrf.mxu1 }
  0xcd   :  { %494 = vrcp.f32 %v163_v46  ;;  %v418_v55 = vadd.f32 %v417_v53, %v398_v51  ;;  %v175_v56 = vand.u32 2147483648, %v163_v46  ;;  %v173_v59 = vand.u32 2147483647, %v163_v46 }
  0xce   :  { %vm169_vm10 = vweird.f32 %v163_v46 }
  0xcf   :  { %v438_v60 = vadd.f32 %v437_v57, %v418_v55  ;;  %v176_v61 = vor.u32 1.1754944e-38, %v175_v56  ;;  %vm174_vm12 = vcmp.eq.f32.partialorder %v173_v59, 8.507059e+37 }
  0xd3   :  { %v495_v52 = vpop.eup %494 }
  0xd4   :  { %v165_v54 = vmul.f32 %v495_v52, %v163_v46  ;;  %vm170_vm9 = vweird.f32 %v495_v52 }
  0xd5   :  { %vm171_vm11 = vmor %vm169_vm10, %vm170_vm9 }
  0xd6   :  { %v166_v37 = vsub.f32 1.0, %v165_v54 }
  0xd8   :  { %v167_v58 = vmul.f32 %v495_v52, %v166_v37 }
  0xda   :  { %v168_v36 = vadd.f32 %v495_v52, %v167_v58 }
  0xdc   :  { %v172_v62 = vsel %vm171_vm11, %v495_v52, %v168_v36 }
  0xdd   :  { %v177_v0 = vsel %vm174_vm12, %v176_v61, %v172_v62 }
  0xde   :  { %v440_v1 = vmul.f32 %v438_v60, %v177_v0 }
  0xe0   :  { %v445_v2 = vadd.f32 %v491_v63, %v440_v1 }
  0xe2   :  { %v449_v3 = vand.u32 2147483647, %v445_v2  ;;  %v448_v13 = vmax.f32 %v445_v2, 0.0 }
  0xe4   :  { %v450_v4 = vsub.f32 0.0, %v449_v3 }
  0xe6   :  { %v451_v5 = vmul.f32 1.442695, %v450_v4 }
  0xe8   :  { %496 = vpow2.f32 %v451_v5 }
  0xee   :  { %v497_v6 = vpop.eup %496 }
  0xef   :  { %v453_v7 = vadd.f32 1.0, %v497_v6 }
  0xf1   :  { %498 = vlog2.f32 %v453_v7 }
  0xf7   :  { %v499_v12 = vpop.eup %498 }
  0xf8   :  { %v455_v10 = vmul.f32 0.6931472, %v499_v12 }
  0xfa   :  { %v456_v14 = vadd.f32 %v455_v10, %v448_v13 }
  0xfc   :  { %v458_v15 = vadd.f32 2.0, %v456_v14  ;;  %v461_v16 = vsel %vm460_vm13, %v456_v14, %v163_v46 }
  0xfd   :  { %v462_v17 = vsel %vm459_vm14, %v445_v2, %v461_v16 }
  0xfe   :  { %v463_v18 = vsel %vm457_vm15, %v458_v15, %v462_v17 }
  0xff   :  { %464 = vst [vmem:[#allocation9] sm:$0x3] %v463_v18 }
 0x100   :  { %475 = dma.vmem_to_hbm [thread:$0]  %s471_s3, 32, %s473_s13, [#allocation5]  }
 0x101   :  { %600 = dma.done.wait [#allocation5], 32  }
 0x102   :  { %601 = vsyncadd [#allocation5], 4294967264 }
 0x103   :  { %480 = vsyncpa [#allocation4], 1 }
 0x104   :  { %481 = vsyncpa [#allocation7], 1 }
 0x105   :  { %482 = vsyncpa [#allocation5], 1 }

</bundles_post_ra>
